<compile_context>
chip_gen: v7x
topology: tpu7x:2x2x1
jax: 0.10.0
libtpu: 0.0.40
codegen_flags: <defaults>
</compile_context>

<pallas_src>
import jax
import jax.numpy as jnp
from jax.experimental import pallas as pl
from jax.experimental.pallas import tpu as pltpu

IN_DIM = 772
H1 = 128        # Config.MLP_HIDDEN_DIMENSION_1 (synthetic)
H2 = 64         # Config.MLP_HIDDEN_DIMENSION_2 (synthetic)
H2_PAD = 128    # H2 zero-padded to a full 128-lane tile
OUT_DIM = 1


def _round_up(n, m):
    return ((n + m - 1) // m) * m


def mlp_kernel(x_ref, w1_ref, b1_ref, w2_ref, b2_ref, w3r_ref, b3_ref, o_ref):
    # x: (TILE_B, 772) bf16; weights bf16; biases / w3 row in f32.
    x = x_ref[...]
    # Layer 1: MXU matmul, f32 accumulate, f32 tanh (EUP).
    h1 = jnp.tanh(
        jnp.dot(x, w1_ref[...], preferred_element_type=jnp.float32) + b1_ref[...]
    )                                                               # (TILE_B, H1) f32
    # Layer 2: bf16 MXU inputs, f32 accumulate. Padded H2 lanes give tanh(0)=0.
    h2 = jnp.tanh(
        jnp.dot(h1.astype(jnp.bfloat16), w2_ref[...],
                preferred_element_type=jnp.float32) + b2_ref[...]
    )                                                               # (TILE_B, H2_PAD) f32
    # Layer 3: N=1 "matmul" done as a VPU multiply + lane reduction (MXU stays free).
    # Padded w3 lanes are zero, so they contribute nothing to the sum.
    z = jnp.sum(h2 * w3r_ref[...], axis=-1, keepdims=True) + b3_ref[...]  # (TILE_B, 1)
    o_ref[...] = jax.nn.sigmoid(z)


def mlp_pallas(x, w1, b1, w2, b2, w3, b3, *, tile_b=512):
    """x: (B, 772) f32.  w*: (in, out) f32, b*: (1, out) f32.  Returns (B, 1) f32."""
    B = x.shape[0]

    # Tile size: large (512) for throughput, but shrink for tiny batches.
    tile_b = min(tile_b, max(8, _round_up(B, 8)))
    Bp = _round_up(B, tile_b)
    if Bp != B:
        x = jnp.pad(x, ((0, Bp - B), (0, 0)))

    # HBM-side dtype prep: bf16 inputs/weights for the two MXU layers.
    x_bf = x.astype(jnp.bfloat16)
    w1_bf = w1.astype(jnp.bfloat16)
    # Pad H2 -> H2_PAD with zeros (columns of w2, lanes of b2 and w3 row).
    w2_bf = jnp.pad(w2, ((0, 0), (0, H2_PAD - H2))).astype(jnp.bfloat16)
    b2_p = jnp.pad(b2, ((0, 0), (0, H2_PAD - H2)))
    w3_row = jnp.pad(w3.reshape(1, H2), ((0, 0), (0, H2_PAD - H2)))   # (1, H2_PAD) f32
    b3_p = b3.reshape(1, OUT_DIM)

    grid = (Bp // tile_b,)

    out = pl.pallas_call(
        mlp_kernel,
        out_shape=jax.ShapeDtypeStruct((Bp, OUT_DIM), jnp.float32),
        grid=grid,
        in_specs=[
            pl.BlockSpec((tile_b, IN_DIM), lambda i: (i, 0)),   # x tile (pipelined)
            pl.BlockSpec((IN_DIM, H1), lambda i: (0, 0)),       # w1 (resident)
            pl.BlockSpec((1, H1), lambda i: (0, 0)),            # b1
            pl.BlockSpec((H1, H2_PAD), lambda i: (0, 0)),       # w2
            pl.BlockSpec((1, H2_PAD), lambda i: (0, 0)),        # b2
            pl.BlockSpec((1, H2_PAD), lambda i: (0, 0)),        # w3 row
            pl.BlockSpec((1, OUT_DIM), lambda i: (0, 0)),       # b3
        ],
        out_specs=pl.BlockSpec((tile_b, OUT_DIM), lambda i: (i, 0)),
        compiler_params=pltpu.CompilerParams(
            dimension_semantics=("parallel",),      # shard batch over 2 TCs on v7x
            vmem_limit_bytes=32 * 1024 * 1024,
        ),
    )(x_bf, w1_bf, b1, w2_bf, b2_p, w3_row, b3_p)

    return out[:B]


def init_params(key):
    k1, k2, k3 = jax.random.split(key, 3)
    # Deterministic synthetic init (uniform, PyTorch-Linear-style bound 1/sqrt(fan_in)).
    def linear(k, fan_in, fan_out):
        kw, kb = jax.random.split(k)
        bound = 1.0 / jnp.sqrt(fan_in)
        w = jax.random.uniform(kw, (fan_in, fan_out), jnp.float32, -bound, bound)
        b = jax.random.uniform(kb, (1, fan_out), jnp.float32, -bound, bound)
        return w, b

    w1, b1 = linear(k1, IN_DIM, H1)
    w2, b2 = linear(k2, H1, H2)
    w3, b3 = linear(k3, H2, OUT_DIM)
    return w1, b1, w2, b2, w3, b3


def reference(x, w1, b1, w2, b2, w3, b3):
    # Same dtype pipeline as the kernel: bf16 MXU inputs, f32 accumulation/activations.
    h1 = jnp.tanh(
        jnp.dot(x.astype(jnp.bfloat16), w1.astype(jnp.bfloat16),
                preferred_element_type=jnp.float32) + b1)
    h2 = jnp.tanh(
        jnp.dot(h1.astype(jnp.bfloat16), w2.astype(jnp.bfloat16),
                preferred_element_type=jnp.float32) + b2)
    return jax.nn.sigmoid(h2 @ w3 + b3)


if __name__ == "__main__":
    key = jax.random.PRNGKey(0)
    kx, kp = jax.random.split(key)

    B = 8
    x = jax.random.normal(kx, (B, IN_DIM), jnp.float32)
    params = init_params(kp)

    out = mlp_pallas(x, *params)
    out = jax.block_until_ready(out)

    ref = reference(x, *params)
    assert out.shape == (B, OUT_DIM)
    assert jnp.allclose(out, ref, atol=1e-3, rtol=1e-3), \
        f"max abs diff {jnp.max(jnp.abs(out - ref))}"

    print("KERNEL_OK")
</pallas_src>

<mosaic_0001>
module attributes {stable_mosaic.version = 11 : i64} {
  func.func @mlp_kernel(%arg0: i32, %arg1: memref<8x772xbf16, #tpu.memory_space<vmem>>, %arg2: memref<772x128xbf16, #tpu.memory_space<vmem>>, %arg3: memref<1x128xf32, #tpu.memory_space<vmem>>, %arg4: memref<128x128xbf16, #tpu.memory_space<vmem>>, %arg5: memref<1x128xf32, #tpu.memory_space<vmem>>, %arg6: memref<1x128xf32, #tpu.memory_space<vmem>>, %arg7: memref<1x1xf32, #tpu.memory_space<vmem>>, %arg8: memref<8x1xf32, #tpu.memory_space<vmem>>) attributes {dimension_semantics = [#tpu.dimension_semantics<parallel>], iteration_bounds = array<i64: 1>, scalar_prefetch = 0 : i64, scratch_operands = 0 : i64, tpu.core_type = #tpu.core_type<tc>, window_params = [{transform_indices = @transform_0, window_bounds = array<i64: 8, 772>}, {pipeline_mode = #tpu.pipeline_mode<synchronous>, transform_indices = @transform_1, window_bounds = array<i64: 772, 128>}, {pipeline_mode = #tpu.pipeline_mode<synchronous>, transform_indices = @transform_2, window_bounds = array<i64: 1, 128>}, {pipeline_mode = #tpu.pipeline_mode<synchronous>, transform_indices = @transform_3, window_bounds = array<i64: 128, 128>}, {pipeline_mode = #tpu.pipeline_mode<synchronous>, transform_indices = @transform_4, window_bounds = array<i64: 1, 128>}, {pipeline_mode = #tpu.pipeline_mode<synchronous>, transform_indices = @transform_5, window_bounds = array<i64: 1, 128>}, {pipeline_mode = #tpu.pipeline_mode<synchronous>, transform_indices = @transform_6, window_bounds = array<i64: 1, 1>}, {transform_indices = @transform_7, window_bounds = array<i64: 8, 1>}]} {
    %c0 = arith.constant 0 : index
    %c0_0 = arith.constant 0 : index
    %0 = vector.load %arg1[%c0, %c0_0] : memref<8x772xbf16, #tpu.memory_space<vmem>>, vector<8x772xbf16>
    %c0_1 = arith.constant 0 : index
    %c0_2 = arith.constant 0 : index
    %1 = vector.load %arg2[%c0_1, %c0_2] : memref<772x128xbf16, #tpu.memory_space<vmem>>, vector<772x128xbf16>
    %cst = arith.constant dense<0.000000e+00> : vector<8x128xf32>
    %2 = tpu.matmul %0, %1, %cst {dimension_numbers = #tpu.dot_dimension_numbers<[1], [0], [0], [1], [0, 0, 1, 1], [], []>} : vector<8x772xbf16>, vector<772x128xbf16>, vector<8x128xf32> -> vector<8x128xf32>
    %c0_3 = arith.constant 0 : index
    %c0_4 = arith.constant 0 : index
    %3 = vector.load %arg3[%c0_3, %c0_4] : memref<1x128xf32, #tpu.memory_space<vmem>>, vector<1x128xf32>
    %4 = vector.broadcast %3 : vector<1x128xf32> to vector<8x128xf32>
    %5 = arith.addf %2, %4 : vector<8x128xf32>
    %6 = math.tanh %5 : vector<8x128xf32>
    %7 = arith.truncf %6 : vector<8x128xf32> to vector<8x128xbf16>
    %c0_5 = arith.constant 0 : index
    %c0_6 = arith.constant 0 : index
    %8 = vector.load %arg4[%c0_5, %c0_6] : memref<128x128xbf16, #tpu.memory_space<vmem>>, vector<128x128xbf16>
    %cst_7 = arith.constant dense<0.000000e+00> : vector<8x128xf32>
    %9 = tpu.matmul %7, %8, %cst_7 {dimension_numbers = #tpu.dot_dimension_numbers<[1], [0], [0], [1], [0, 0, 1, 1], [], []>} : vector<8x128xbf16>, vector<128x128xbf16>, vector<8x128xf32> -> vector<8x128xf32>
    %c0_8 = arith.constant 0 : index
    %c0_9 = arith.constant 0 : index
    %10 = vector.load %arg5[%c0_8, %c0_9] : memref<1x128xf32, #tpu.memory_space<vmem>>, vector<1x128xf32>
    %11 = vector.broadcast %10 : vector<1x128xf32> to vector<8x128xf32>
    %12 = arith.addf %9, %11 : vector<8x128xf32>
    %13 = math.tanh %12 : vector<8x128xf32>
    %c0_10 = arith.constant 0 : index
    %c0_11 = arith.constant 0 : index
    %14 = vector.load %arg6[%c0_10, %c0_11] : memref<1x128xf32, #tpu.memory_space<vmem>>, vector<1x128xf32>
    %15 = vector.broadcast %14 : vector<1x128xf32> to vector<8x128xf32>
    %16 = arith.mulf %13, %15 : vector<8x128xf32>
    %cst_12 = arith.constant dense<0.000000e+00> : vector<8xf32>
    %17 = vector.multi_reduction <add>, %16, %cst_12 [1] : vector<8x128xf32> to vector<8xf32>
    %18 = vector.shape_cast %17 : vector<8xf32> to vector<8x1xf32>
    %c0_13 = arith.constant 0 : index
    %c0_14 = arith.constant 0 : index
    %19 = vector.load %arg7[%c0_13, %c0_14] : memref<1x1xf32, #tpu.memory_space<vmem>>, vector<1x1xf32>
    %20 = vector.broadcast %19 : vector<1x1xf32> to vector<8x1xf32>
    %21 = arith.addf %18, %20 : vector<8x1xf32>
    %22 = arith.negf %21 : vector<8x1xf32>
    %23 = math.exp %22 : vector<8x1xf32>
    %cst_15 = arith.constant 1.000000e+00 : f32
    %24 = vector.broadcast %cst_15 : f32 to vector<8x1xf32>
    %25 = arith.addf %24, %23 : vector<8x1xf32>
    %26 = arith.divf %24, %25 : vector<8x1xf32>
    %c0_16 = arith.constant 0 : index
    %c0_17 = arith.constant 0 : index
    %27 = vector.load %arg8[%c0_16, %c0_17] : memref<8x1xf32, #tpu.memory_space<vmem>>, vector<8x1xf32>
    tpu.vector_store %arg8[%c0_16, %c0_17], %26 {strides = array<i32>} : memref<8x1xf32, #tpu.memory_space<vmem>>, vector<8x1xf32>,
    return
  }
  func.func @transform_0(%arg0: i32) -> (i32, i32) {
    %c0_i32 = arith.constant 0 : i32
    %c0_i32_0 = arith.constant 0 : i32
    return %arg0, %c0_i32 : i32, i32
  }
  func.func @transform_1(%arg0: i32) -> (i32, i32) {
    %c0_i32 = arith.constant 0 : i32
    %c0_i32_0 = arith.constant 0 : i32
    %c0_i32_1 = arith.constant 0 : i32
    return %c0_i32, %c0_i32_0 : i32, i32
  }
  func.func @transform_2(%arg0: i32) -> (i32, i32) {
    %c0_i32 = arith.constant 0 : i32
    %c0_i32_0 = arith.constant 0 : i32
    %c0_i32_1 = arith.constant 0 : i32
    return %c0_i32, %c0_i32_0 : i32, i32
  }
  func.func @transform_3(%arg0: i32) -> (i32, i32) {
    %c0_i32 = arith.constant 0 : i32
    %c0_i32_0 = arith.constant 0 : i32
    %c0_i32_1 = arith.constant 0 : i32
    return %c0_i32, %c0_i32_0 : i32, i32
  }
  func.func @transform_4(%arg0: i32) -> (i32, i32) {
    %c0_i32 = arith.constant 0 : i32
    %c0_i32_0 = arith.constant 0 : i32
    %c0_i32_1 = arith.constant 0 : i32
    return %c0_i32, %c0_i32_0 : i32, i32
  }
  func.func @transform_5(%arg0: i32) -> (i32, i32) {
    %c0_i32 = arith.constant 0 : i32
    %c0_i32_0 = arith.constant 0 : i32
    %c0_i32_1 = arith.constant 0 : i32
    return %c0_i32, %c0_i32_0 : i32, i32
  }
  func.func @transform_6(%arg0: i32) -> (i32, i32) {
    %c0_i32 = arith.constant 0 : i32
    %c0_i32_0 = arith.constant 0 : i32
    %c0_i32_1 = arith.constant 0 : i32
    return %c0_i32, %c0_i32_0 : i32, i32
  }
  func.func @transform_7(%arg0: i32) -> (i32, i32) {
    %c0_i32 = arith.constant 0 : i32
    %c0_i32_0 = arith.constant 0 : i32
    return %arg0, %c0_i32 : i32, i32
  }
}

</mosaic_0001>

<bundles_post_ra>
// kernel: tpu_custom_call.1
= control target key start
LH: loop header
LB: loop body
LE: loop exit
PB: predicated region body
PF: predicated region fallthrough
CT: control target
= control target key end

     0   :  { %s1233_s0 = inlined_call_operand.hbm [shape: bf16[8,772], index: 0, kind: input, shape index: {}]   ;;  %s1234_s1 = inlined_call_operand.hbm [shape: bf16[772,128], index: 1, kind: input, shape index: {}]   ;;  %s1235_s2 = inlined_call_operand.vmem [shape: f32[1,128], index: 2, kind: input, shape index: {}]   ;;  %s1236_s3 = inlined_call_operand.hbm [shape: bf16[128,128], index: 3, kind: input, shape index: {}]   ;;  %s1237_s4 = inlined_call_operand.vmem [shape: f32[1,128], index: 4, kind: input, shape index: {}]   ;;  %s1238_s5 = inlined_call_operand.vmem [shape: f32[1,128], index: 5, kind: input, shape index: {}]   ;;  %s1239_s6 = inlined_call_operand.<no memory space> [shape: f32[1,1], index: 6, kind: input, shape index: {}]   ;;  %s1240_s7 = inlined_call_operand.vmem [shape: f32[8,1], index: 7, kind: output, shape index: {}]  }
   0x1   :  { %v12_v0 = vstv %s1239_s6 }
   0x2   :  { %13 = vst [vmem:[#allocation2] sm:$0x1] %v12_v0 }
   0x3   :  { %14 = vsyncpa [#allocation4], 0 }
   0x4   :  { %15 = vsyncpa [#allocation6], 0  ;;  %s1127_s26 = smov [#allocation5]   ;;  %s1057_s30 = scalar_lea.hbm %s1234_s1, 6208 }
   0x5   :  { %s31_s27 = sshll.u32 %s1127_s26, 4  ;;  %p1058_p0 = scmp.ne.s32.totalorder %s1234_s1, %s1057_s30  ;;  %s32_s27 = int_to_ptr.vmem [resolvable:$true] %s31_s27 }
   0x6   :  { %p1061_p1 = scmp.lt.u32.totalorder %s1057_s30, %s1234_s1 }
   0x8   :  { %p1063_p2 = pnand %p1061_p1, %p1058_p0 }
   0xa   :  { %1066 = shalt.err (!%p1063_p2)
}
   0xb   :  { %s1067_s6 = scalar_lea.vmem %s32_s27, 6208  ;;  %p1072_p4 = scmp.lt.s32.totalorder %s32_s27, %s32_s27 }
   0xc   :  { %p1068_p3 = scmp.ne.s32.totalorder %s32_s27, %s1067_s6  ;;  %p1073_p5 = scmp.lt.s32.totalorder %s1067_s6, %s1067_s6 }
   0xe   :  { %p1074_p6 = por %p1073_p5, %p1072_p4 }
  0x10   :  { %p1075_p7 = pnand %p1074_p6, %p1068_p3 }
  0x12   :  { %1078 = shalt.err (!%p1075_p7)
}
  0x13   :  { %s1128_s12 = smov 64   ;;  %s1129_s13 = smov 4  }
  0x14   :  { %37 = dma.hbm_to_vmem [thread:$0]  %s1234_s1, 6208, %s32_s27, [#allocation6], %s1128_s12, %s1128_s12, %s1129_s13  }
  0x15   :  { %s1130_s16 = smov [#allocation3]   ;;  %s1131_s18 = smov [#allocation7]  }
  0x16   :  { %s22_s17 = sshll.u32 %s1130_s16, 4  ;;  %s45_s19 = sshll.u32 %s1131_s18, 4  ;;  %s23_s17 = int_to_ptr.vmem [resolvable:$true] %s22_s17  ;;  %s46_s19 = int_to_ptr.vmem [resolvable:$true] %s45_s19 }
  0x17   :  { %s1079_s22 = scalar_lea.hbm %s1233_s0, 448 }
  0x18   :  { %p1080_p8 = scmp.ne.s32.totalorder %s1233_s0, %s1079_s22  ;;  %p1083_p9 = scmp.lt.u32.totalorder %s1079_s22, %s1233_s0 }
  0x1a   :  { %p1085_p10 = pnand %p1083_p9, %p1080_p8 }
  0x1c   :  { %1088 = shalt.err (!%p1085_p10)
}
  0x1d   :  { %s1089_s1 = scalar_lea.vmem %s23_s17, 448  ;;  %p1094_p12 = scmp.lt.s32.totalorder %s23_s17, %s23_s17 }
  0x1e   :  { %p1090_p11 = scmp.ne.s32.totalorder %s23_s17, %s1089_s1  ;;  %p1095_p13 = scmp.lt.s32.totalorder %s1089_s1, %s1089_s1 }
  0x20   :  { %p1096_p0 = por %p1095_p13, %p1094_p12 }
  0x22   :  { %p1097_p1 = pnand %p1096_p0, %p1090_p11 }
  0x24   :  { %1100 = shalt.err (!%p1097_p1)
}
  0x25   :  { %25 = dma.hbm_to_vmem [thread:$0]  %s1233_s0, 448, %s23_s17, [#allocation4]  }
  0x26   :  { %s1101_s8 = scalar_lea.hbm %s1236_s3, 1024 }
  0x27   :  { %p1102_p2 = scmp.ne.s32.totalorder %s1236_s3, %s1101_s8  ;;  %p1105_p3 = scmp.lt.u32.totalorder %s1101_s8, %s1236_s3 }
  0x29   :  { %p1107_p4 = pnand %p1105_p3, %p1102_p2 }
  0x2b   :  { %1110 = shalt.err (!%p1107_p4)
}
  0x2c   :  { %s1111_s14 = scalar_lea.vmem %s46_s19, 1024  ;;  %p1116_p6 = scmp.lt.s32.totalorder %s46_s19, %s46_s19 }
  0x2d   :  { %p1112_p5 = scmp.ne.s32.totalorder %s46_s19, %s1111_s14  ;;  %p1117_p7 = scmp.lt.s32.totalorder %s1111_s14, %s1111_s14 }
  0x2f   :  { %p1118_p8 = por %p1117_p7, %p1116_p6 }
  0x31   :  { %p1119_p9 = pnand %p1118_p8, %p1112_p5 }
  0x33   :  { %1122 = shalt.err (!%p1119_p9)
}
  0x34   :  { %51 = dma.hbm_to_vmem [thread:$0]  %s1236_s3, 1024, %s46_s19, [#allocation6], %s1128_s12, %s1128_s12, %s1129_s13  }
  0x35   :  { %1123 = dma.done.wait [#allocation4], 448  }
  0x36   :  { %1124 = vsyncadd [#allocation4], 4294966848 }
  0x37   :  { %1125 = dma.done.wait [#allocation6], 7232  }
  0x38   :  { %1126 = vsyncadd [#allocation6], 4294960064  ;;  %v985_v1 = vld [vmem:[#allocation5 + $0x40] sm:$0xff]   ;;  %v989_v5 = vld [vmem:[#allocation5 + $0x48] sm:$0xff]   ;;  %v1132_v44 = vmov 0.0   ;;  %vm1133_vm0 = vmmov 0  }
  0x39   :  { %v986_v2 = vld [vmem:[#allocation5] sm:$0xff]   ;;  %875 = vmatprep.subr.bf16.mxu0 %v985_v1  ;;  %v990_v6 = vld [vmem:[#allocation5 + $0x8] sm:$0xff]   ;;  %v993_v9 = vld [vmem:[#allocation5 + $0x50] sm:$0xff]   ;;  %vm495_vm1 = vcmask 1041408   ;;  %vm491_vm2 = vcmask 31744   ;;  %vm797_vm3 = vcmask 7168  }
  0x3a   :  { %v987_v3 = vld [vmem:[#allocation5 + $0xc0] sm:$0xff]   ;;  %876 = vmatpush3.bf16.msra.mxu0 %v986_v2  ;;  %v991_v7 = vld [vmem:[#allocation5 + $0xc8] sm:$0xff]   ;;  %v994_v10 = vld [vmem:[#allocation5 + $0x10] sm:$0xff]  }
  0x3b   :  { %v988_v4 = vld [vmem:[#allocation5 + $0x80] sm:$0xff]   ;;  %897 = vmatprep.subr.bf16.mxu1 %v987_v3  ;;  %877 = vmatprep.subr.bf16.mxu0 %v989_v5  ;;  %v992_v8 = vld [vmem:[#allocation5 + $0x88] sm:$0xff]   ;;  %v995_v11 = vld [vmem:[#allocation5 + $0xd0] sm:$0xff]  }
  0x3c   :  { %898 = vmatpush3.bf16.msra.mxu1 %v988_v4  ;;  %v996_v12 = vld [vmem:[#allocation5 + $0x90] sm:$0xff]   ;;  %v997_v13 = vld [vmem:[#allocation5 + $0x58] sm:$0xff]   ;;  %v1001_v17 = vld [vmem:[#allocation5 + $0x60] sm:$0xff]  }
  0x3d   :  { %899 = vmatprep.subr.bf16.mxu1 %v991_v7  ;;  %v998_v14 = vld [vmem:[#allocation5 + $0x18] sm:$0xff]   ;;  %v1002_v18 = vld [vmem:[#allocation5 + $0x20] sm:$0xff]   ;;  %v1005_v21 = vld [vmem:[#allocation5 + $0x68] sm:$0xff]  }
  0x3e   :  { %878 = vmatpush3.bf16.msra.mxu0 %v990_v6  ;;  %v999_v15 = vld [vmem:[#allocation5 + $0xd8] sm:$0xff]   ;;  %v1003_v19 = vld [vmem:[#allocation5 + $0xe0] sm:$0xff]   ;;  %v1006_v22 = vld [vmem:[#allocation5 + $0x28] sm:$0xff]  }
  0x3f   :  { %879 = vmatprep.subr.bf16.mxu0 %v993_v9  ;;  %v1000_v16 = vld [vmem:[#allocation5 + $0x98] sm:$0xff]   ;;  %v1004_v20 = vld [vmem:[#allocation5 + $0xa0] sm:$0xff]   ;;  %v1007_v23 = vld [vmem:[#allocation5 + $0xe8] sm:$0xff]  }
  0x40   :  { %900 = vmatpush3.bf16.msra.mxu1 %v992_v8  ;;  %v1008_v24 = vld [vmem:[#allocation5 + $0xa8] sm:$0xff]   ;;  %v1009_v25 = vld [vmem:[#allocation5 + $0x70] sm:$0xff]   ;;  %v1013_v29 = vld [vmem:[#allocation5 + $0x78] sm:$0xff]  }
  0x41   :  { %901 = vmatprep.subr.bf16.mxu1 %v995_v11  ;;  %v1010_v26 = vld [vmem:[#allocation5 + $0x30] sm:$0xff]   ;;  %v1014_v30 = vld [vmem:[#allocation5 + $0x38] sm:$0xff]   ;;  %v68_v32 = vld [vmem:[#allocation3] sm:$0xff] }
  0x42   :  { %880 = vmatpush3.bf16.msra.mxu0 %v994_v10  ;;  %v1011_v27 = vld [vmem:[#allocation5 + $0xf0] sm:$0xff]   ;;  %v1015_v31 = vld [vmem:[#allocation5 + $0xf8] sm:$0xff]   ;;  %v806_v33 = vcombine.low %v68_v32, %v68_v32  ;;  %v807_v34 = vcombine.high %v68_v32, %v68_v32  ;;  %v1019_v36 = vld [vmem:[#allocation5 + $0x140] sm:$0xff]  }
  0x43   :  { %881 = vmatprep.subr.bf16.mxu0 %v997_v13  ;;  %v1012_v28 = vld [vmem:[#allocation5 + $0xb0] sm:$0xff]   ;;  %v1018_v35 = vld [vmem:[#allocation5 + $0xb8] sm:$0xff]   ;;  %v1022_v40 = vld [vmem:[#allocation5 + $0x100] sm:$0xff]  }
  0x44   :  { %902 = vmatpush3.bf16.msra.mxu1 %v996_v12  ;;  %v69_v37 = vld [vmem:[#allocation3 + $0x8] sm:$0xff]  ;;  %531 = vmatprep.mubr.bf16.mxu0 %v807_v34  ;;  %v1027_v46 = vld [vmem:[#allocation5 + $0x158] sm:$0xff]   ;;  %v1029_v48 = vld [vmem:[#allocation5 + $0x160] sm:$0xff]  }
  0x45   :  { %903 = vmatprep.subr.bf16.mxu1 %v999_v15  ;;  %v808_v38 = vcombine.low %v69_v37, %v69_v37  ;;  %v809_v39 = vcombine.high %v69_v37, %v69_v37  ;;  %v1023_v41 = vld [vmem:[#allocation5 + $0x148] sm:$0xff]   ;;  %v1025_v43 = vld [vmem:[#allocation5 + $0x150] sm:$0xff]   ;;  %v1028_v47 = vld [vmem:[#allocation5 + $0x118] sm:$0xff]  }
  0x46   :  { %882 = vmatpush3.bf16.msra.mxu0 %v998_v14  ;;  %v1024_v42 = vld [vmem:[#allocation5 + $0x108] sm:$0xff]   ;;  %v1026_v45 = vld [vmem:[#allocation5 + $0x110] sm:$0xff]   ;;  %v1030_v49 = vld [vmem:[#allocation5 + $0x120] sm:$0xff]  }
  0x47   :  { %883 = vmatprep.subr.bf16.mxu0 %v1001_v17  ;;  %571 = vmatprep.mubr.bf16.mxu1 %v809_v39  ;;  %v1031_v50 = vld [vmem:[#allocation5 + $0x168] sm:$0xff]   ;;  %v1037_v51 = vld [vmem:[#allocation5 + $0x180] ss:$0 sps:$4 sm:$0x33]   ;;  %v70_v52 = vld [vmem:[#allocation3 + $0x10] sm:$0xff] }
  0x48   :  { %904 = vmatpush3.bf16.msra.mxu1 %v1000_v16  ;;  %v1032_v53 = vld [vmem:[#allocation5 + $0x128] sm:$0xff]   ;;  %v811_v54 = vcombine.high %v70_v52, %v70_v52  ;;  %v1040_v55 = vld [vmem:[#allocation3 + $0x18] ss:$0 sps:$4 sm:$0xff]   ;;  %v1033_v56 = vld [vmem:[#allocation5 + $0x170] sm:$0xff]   ;;  %v497_v57 = vsel %vm495_vm1, %v1037_v51, 0  ;;  %v810_v61 = vcombine.low %v70_v52, %v70_v52 }
  0x49   :  { %905 = vmatprep.subr.bf16.mxu1 %v1003_v19  ;;  %v1034_v58 = vld [vmem:[#allocation5 + $0x130] sm:$0xff]   ;;  %v1035_v59 = vld [vmem:[#allocation5 + $0x178] sm:$0xff]   ;;  %v1041_v62 = vld [vmem:[#allocation7] sm:$0xff]  }
  0x4a   :  { %884 = vmatpush3.bf16.msra.mxu0 %v1002_v18  ;;  %v1036_v60 = vld [vmem:[#allocation5 + $0x138] sm:$0xff]   ;;  %v1042_v63 = vld [vmem:[#allocation7 + $0x8] sm:$0xff]   ;;  %v1045_v2 = vld [vmem:[#allocation7 + $0x20] sm:$0xff]  }
  0x4b   :  { %885 = vmatprep.subr.bf16.mxu0 %v1005_v21  ;;  %v1043_v0 = vld [vmem:[#allocation7 + $0x10] sm:$0xff]   ;;  %v1044_v1 = vld [vmem:[#allocation7 + $0x18] sm:$0xff]   ;;  %v1046_v3 = vld [vmem:[#allocation7 + $0x28] sm:$0xff]  }
  0x4c   :  { %906 = vmatpush3.bf16.msra.mxu1 %v1004_v20  ;;  %v1047_v4 = vld [vmem:[#allocation7 + $0x30] sm:$0xff]   ;;  %v1048_v5 = vld [vmem:[#allocation7 + $0x38] sm:$0xff]  }
  0x4d   :  { %907 = vmatprep.subr.bf16.mxu1 %v1007_v23  ;;  %v805_v7 = vld [vmem:[%s1235_s2] ss:$0 sm:$0xff] }
  0x4e   :  { %886 = vmatpush3.bf16.msra.mxu0 %v1006_v22  ;;  %v863_v32 = vld [vmem:[%s1237_s4] ss:$0 sm:$0xff] }
  0x4f   :  { %887 = vmatprep.subr.bf16.mxu0 %v1009_v25 }
  0x50   :  { %908 = vmatpush3.bf16.msra.mxu1 %v1008_v24 }
  0x51   :  { %909 = vmatprep.subr.bf16.mxu1 %v1011_v27 }
  0x52   :  { %888 = vmatpush3.bf16.msra.mxu0 %v1010_v26 }
  0x53   :  { %889 = vmatprep.subr.bf16.mxu0 %v1013_v29 }
  0x54   :  { %910 = vmatpush3.bf16.msra.mxu1 %v1012_v28 }
  0x55   :  { %911 = vmatprep.subr.bf16.mxu1 %v1015_v31 }
  0x56   :  { %890 = vmatpush3.bf16.msra.mxu0 %v1014_v30 }
  0x57   :  { %919 = vmatprep.subr.bf16.mxu0 %v1019_v36 }
  0x58   :  { %912 = vmatpush3.bf16.msra.mxu1 %v1018_v35 }
  0x59   :  { %532 = vmatmul.mubr.bf16.vlgmr.msra.gmra.mrb[0].mxu0 %v806_v33  ;;  %952 = vmatprep.subr.bf16.mxu1 %v1132_v44 }
  0x5a   :  { %920 = vmatpush3.bf16.msra.mxu0 %v1022_v40  ;;  %611 = vmatprep.mubr.bf16.mxu0 %v811_v54 }
  0x5b   :  { %572 = vmatmul.mubr.bf16.vlgmr.msra.gmra.mrb[0].mxu1 %v808_v38  ;;  %921 = vmatprep.subr.bf16.mxu0 %v1023_v41  ;;  %v872_v38 = vld [vmem:[%s1238_s5] ss:$0 sm:$0xff] }
  0x5c   :  { %954 = vmatprep.mubr.msk.bf16.mxu1 %vm1133_vm0, %v1132_v44  ;;  %953 = vmatpush3.bf16.msra.mxu1 %v497_v57  ;;  %v873_v41 = vld [vmem:[#allocation2] ss:$0 sm:$0xff] }
  0x5d   :  { %958 = vmatprep.subr.bf16.mxu1 %v1132_v44 }
  0x5e   :  { %922 = vmatpush3.bf16.msra.mxu0 %v1024_v42 }
  0x5f   :  { %923 = vmatprep.subr.bf16.mxu0 %v1025_v43 }
  0x62   :  { %924 = vmatpush3.bf16.msra.mxu0 %v1026_v45 }
  0x63   :  { %925 = vmatprep.subr.bf16.mxu0 %v1027_v46  ;;  %955 = vmatmul.mubr.msk.bf16.vlgmr.msra.gmra.mrb[4].mxu1 %vm491_vm2, %v1040_v55 }
  0x64   :  { %974 = vmatprep.mubr.msk.bf16.mxu1 %vm1133_vm0, %v1132_v44  ;;  %959 = vmatpush3.bf16.msra.mxu1 %v1041_v62 }
  0x65   :  { %960 = vmatprep.subr.bf16.mxu1 %v1132_v44 }
  0x66   :  { %926 = vmatpush3.bf16.msra.mxu0 %v1028_v47 }
  0x67   :  { %927 = vmatprep.subr.bf16.mxu0 %v1029_v48 }
  0x68   :  { %961 = vmatpush3.bf16.msra.mxu1 %v1042_v63 }
  0x69   :  { %962 = vmatprep.subr.bf16.mxu1 %v1132_v44 }
  0x6a   :  { %928 = vmatpush3.bf16.msra.mxu0 %v1030_v49 }
  0x6b   :  { %929 = vmatprep.subr.bf16.mxu0 %v1031_v50 }
  0x6c   :  { %963 = vmatpush3.bf16.msra.mxu1 %v1043_v0 }
  0x6d   :  { %964 = vmatprep.subr.bf16.mxu1 %v1132_v44 }
  0x6e   :  { %930 = vmatpush3.bf16.msra.mxu0 %v1032_v53 }
  0x6f   :  { %931 = vmatprep.subr.bf16.mxu0 %v1033_v56 }
  0x70   :  { %965 = vmatpush3.bf16.msra.mxu1 %v1044_v1 }
  0x71   :  { %966 = vmatprep.subr.bf16.mxu1 %v1132_v44 }
  0x72   :  { %932 = vmatpush3.bf16.msra.mxu0 %v1034_v58 }
  0x73   :  { %933 = vmatprep.subr.bf16.mxu0 %v1035_v59 }
  0x74   :  { %967 = vmatpush3.bf16.msra.mxu1 %v1045_v2 }
  0x75   :  { %968 = vmatprep.subr.bf16.mxu1 %v1132_v44 }
  0x76   :  { %934 = vmatpush3.bf16.msra.mxu0 %v1036_v60 }
  0x78   :  { %969 = vmatpush3.bf16.msra.mxu1 %v1046_v3 }
  0x79   :  { %612 = vmatmul.mubr.bf16.vlgmr.msra.gmra.mrb[4].mxu0 %v810_v61  ;;  %970 = vmatprep.subr.bf16.mxu1 %v1132_v44 }
  0x7c   :  { %971 = vmatpush3.bf16.msra.mxu1 %v1047_v4 }
  0x7d   :  { %972 = vmatprep.subr.bf16.mxu1 %v1132_v44 }
  0x80   :  { %973 = vmatpush3.bf16.msra.mxu1 %v1048_v5 }
 0x12c   :  { %v891_v6 = vpop.f32.mrb[0].mxu0 }
 0x12d   :  { %v892_v8 = vpop.f32.mrb[1].mxu0 }
 0x12e   :  { %v893_v9 = vadd.f32 %v892_v8, %v891_v6  ;;  %v894_v10 = vpop.f32.mrb[2].mxu0  ;;  %v913_v11 = vpop.f32.mrb[0].mxu1 }
 0x12f   :  { %v895_v12 = vpop.f32.mrb[3].mxu0  ;;  %v914_v13 = vpop.f32.mrb[1].mxu1 }
 0x130   :  { %v534_v14 = vadd.f32 %v893_v9, %v805_v7  ;;  %v915_v15 = vadd.f32 %v914_v13, %v913_v11  ;;  %v916_v16 = vpop.f32.mrb[2].mxu1 }
 0x131   :  { %v917_v17 = vpop.f32.mrb[3].mxu1 }
 0x132   :  { %v574_v18 = vadd.f32 %v915_v15, %v534_v14 }
 0x136   :  { %v653_v19 = vpop.f32.mrb[4].mxu1 }
 0x137   :  { %v956_v20 = vpop.f32.mrb[5].mxu1 }
 0x138   :  { %v656_v21 = vpop.f32.mrb[6].mxu1 }
 0x139   :  { %v957_v22 = vpop.f32.mrb[7].mxu1 }
 0x14c   :  { %v935_v23 = vpop.f32.mrb[4].mxu0 }
 0x14d   :  { %v936_v24 = vpop.f32.mrb[5].mxu0 }
 0x14e   :  { %v937_v25 = vadd.f32 %v936_v24, %v935_v23  ;;  %v938_v26 = vpop.f32.mrb[6].mxu0 }
 0x14f   :  { %v939_v27 = vpop.f32.mrb[7].mxu0 }
 0x150   :  { %v614_v28 = vadd.f32 %v937_v25, %v574_v18 }
 0x152   :  { %v654_v29 = vadd.f32 %v653_v19, %v614_v28 }
 0x154   :  { %1049 = vtanh.f32 %v654_v29 }
 0x15e   :  { %v1050_v30 = vpop.eup %1049 }
 0x15f   :  { %v660_v31 = vpack.c.bf16 %v1050_v30, %v1050_v30 }
 0x161   :  { %975 = vmatmul.mubr.bf16.vlgmr.msra.gmra.mrb[8].mxu1 %v660_v31 }
 0x234   :  { %v766_v33 = vpop.f32.mrb[8].mxu1 }
 0x235   :  { %v767_v34 = vadd.f32 %v863_v32, %v766_v33  ;;  %v976_v35 = vpop.f32.mrb[9].mxu1 }
 0x236   :  { %v769_v36 = vpop.f32.mrb[10].mxu1 }
 0x237   :  { %1051 = vtanh.f32 %v767_v34  ;;  %v977_v37 = vpop.f32.mrb[11].mxu1 }
 0x241   :  { %v1052_v39 = vpop.eup %1051 }
 0x242   :  { %v780_v40 = vmul.f32 %v1052_v39, %v872_v38 }
 0x244   :  { %781 = vadd.xlane.f32.xlu0 %v780_v40 }
 0x2d1   :  { %v782_v42 = vpop.xlane.xlu0 %781 }
 0x2d2   :  { %v790_v43 = vadd.f32 %v873_v41, %v782_v42 }
 0x2d4   :  { %v874_v44 = vmul.f32 -1.442695, %v790_v43 }
 0x2d6   :  { %1053 = vpow2.f32 %v874_v44 }
 0x2e0   :  { %v1054_v45 = vpop.eup %1053 }
 0x2e1   :  { %v794_v46 = vadd.f32 1.0, %v1054_v45 }
 0x2e3   :  { %1055 = vrcp.f32 %v794_v46 }
 0x2ed   :  { %v1056_v47 = vpop.eup %1055 }
 0x2ee   :  { %798 = vst.msk [vmem:[%s1240_s7] sm:$0xff] %vm797_vm3, %v1056_v47 }
 0x2ef   :  { %803 = vsyncpa [#allocation4], 1 }
 0x2f0   :  { %804 = vsyncpa [#allocation6], 1 }

</bundles_post_ra>
